<compile_context>
chip_gen: v7x
topology: tpu7x:2x2x1
jax: 0.10.0
libtpu: 0.0.40
codegen_flags: <defaults>
</compile_context>

<pallas_src>
import jax
import jax.numpy as jnp
from jax.experimental import pallas as pl
from jax.experimental.pallas import tpu as pltpu

NUM_SECTIONS = 6  # DCASE-style section count


def _loss_kernel(logits_ref, side_ref, loss_ref):
    # logits_ref: (S, TN)  classes on sublanes, batch on lanes
    # side_ref:   (3, TN)  f32 rows = [section, other_section, mix_factor]
    # loss_ref:   (1, TN)  f32 lane-dense output
    x = logits_ref[...].astype(jnp.float32)

    sec = side_ref[0:1, :]          # (1, TN)
    other = side_ref[1:2, :]        # (1, TN)
    mix = side_ref[2:3, :]          # (1, TN)

    # Numerically stable log-softmax pieces along the class (sublane) axis.
    m = jnp.max(x, axis=0, keepdims=True)                      # (1, TN)
    z = x - m                                                  # (S, TN)
    lse = jnp.log(jnp.sum(jnp.exp(z), axis=0, keepdims=True))  # (1, TN)

    # Build targets with a sublane iota.  Write-then-overwrite order matches
    # PyTorch: targets[:, section] = mix ; targets[:, other_section] = 1-mix.
    cls = jax.lax.broadcasted_iota(jnp.int32, x.shape, 0).astype(jnp.float32)
    targets = jnp.where(cls == sec, mix, jnp.float32(0.0))
    targets = jnp.where(cls == other, jnp.float32(1.0) - mix, targets)

    # loss = -(logp * targets).sum(class) = sum(targets)*lse - sum(targets*z)
    t_sum = jnp.sum(targets, axis=0, keepdims=True)            # (1, TN)
    t_dot = jnp.sum(targets * z, axis=0, keepdims=True)        # (1, TN)
    loss_ref[...] = t_sum * lse - t_dot


def multi_section_prediction_loss(logits, section, mix_factor=None,
                                  other_section=None, block_n=4096):
    """Forward pass of MultiSectionPredictionTask via a Pallas TPU kernel.

    logits:        (N, NUM_SECTIONS) float (f32 / bf16 / f16)
    section:       (N,) int
    mix_factor:    optional (N,) float
    other_section: optional (N,) int
    returns        (N,) float32 loss
    """
    n, s = logits.shape

    # Pack per-row scalars into one (3, N) f32 side array (single DMA stream).
    sec = section.astype(jnp.float32)
    if mix_factor is None:
        mix = jnp.ones((n,), jnp.float32)
        other = jnp.full((n,), -1.0, jnp.float32)   # never matches -> one-hot
    else:
        mix = mix_factor.astype(jnp.float32)
        other = other_section.astype(jnp.float32)
    side = jnp.stack([sec, other, mix], axis=0)      # (3, N)

    # Batch on lanes: feed logits as (S, N).  (Wrapper-side transpose is
    # layout plumbing; the kernel I/O becomes lane-dense.)
    logits_t = jnp.transpose(logits)                 # (S, N)

    # Lane tile: multiple of 128, capped at block_n, padded up if needed.
    # Per-tile VMEM is ~ (S+3+1) * 4 * TN bytes -> tiny even at TN=4096.
    tn = min(int(block_n), 128 * pl.cdiv(n, 128))
    n_pad = tn * pl.cdiv(n, tn)
    if n_pad != n:
        pad = n_pad - n
        logits_t = jnp.pad(logits_t, ((0, 0), (0, pad)))
        side = jnp.pad(side, ((0, 0), (0, pad)))     # pad rows give finite junk
    grid = (n_pad // tn,)

    loss = pl.pallas_call(
        _loss_kernel,
        out_shape=jax.ShapeDtypeStruct((1, n_pad), jnp.float32),
        grid=grid,
        in_specs=[
            pl.BlockSpec((s, tn), lambda i: (0, i)),
            pl.BlockSpec((3, tn), lambda i: (0, i)),
        ],
        out_specs=pl.BlockSpec((1, tn), lambda i: (0, i)),
        compiler_params=pltpu.CompilerParams(
            dimension_semantics=("parallel",)),
    )(logits_t, side)
    return loss[0, :n]


def _reference_loss(logits, section, mix_factor=None, other_section=None):
    n, s = logits.shape
    targets = jnp.zeros((n, s), jnp.float32)
    rows = jnp.arange(n)
    if mix_factor is None:
        targets = targets.at[rows, section].set(1.0)
    else:
        targets = targets.at[rows, section].set(mix_factor.astype(jnp.float32))
        targets = targets.at[rows, other_section].set(
            1.0 - mix_factor.astype(jnp.float32))
    logp = jax.nn.log_softmax(logits.astype(jnp.float32), axis=1)
    return -(logp * targets).sum(axis=1)


if __name__ == "__main__":
    key = jax.random.PRNGKey(0)
    k1, k2, k3, k4, k5, k6, k7, k8 = jax.random.split(key, 8)

    # Small shapes consistent with the module (n_inliers x NUM_SECTIONS).
    N = 8
    logits = jax.random.normal(k1, (N, NUM_SECTIONS), dtype=jnp.float32)
    section = jax.random.randint(k2, (N,), 0, NUM_SECTIONS, dtype=jnp.int32)
    other_section = jax.random.randint(k3, (N,), 0, NUM_SECTIONS,
                                       dtype=jnp.int32)
    mix_factor = jax.random.uniform(k4, (N,), dtype=jnp.float32)

    # Path 1: no mix_factor (pure one-hot targets).
    loss_onehot = multi_section_prediction_loss(logits, section)
    loss_onehot = jax.block_until_ready(loss_onehot)
    ref_onehot = _reference_loss(logits, section)
    assert jnp.allclose(loss_onehot, ref_onehot, atol=1e-5, rtol=1e-5)

    # Path 2: mixed targets (including possible section == other_section).
    loss_mix = multi_section_prediction_loss(logits, section, mix_factor,
                                             other_section)
    loss_mix = jax.block_until_ready(loss_mix)
    ref_mix = _reference_loss(logits, section, mix_factor, other_section)
    assert jnp.allclose(loss_mix, ref_mix, atol=1e-5, rtol=1e-5)

    # Path 3: multi-tile grid + ragged N (exercises padding + pipelining),
    # with bf16 logits upcast in-kernel.
    N2 = 300
    logits2 = jax.random.normal(k5, (N2, NUM_SECTIONS),
                                dtype=jnp.float32).astype(jnp.bfloat16)
    section2 = jax.random.randint(k6, (N2,), 0, NUM_SECTIONS, dtype=jnp.int32)
    other2 = jax.random.randint(k7, (N2,), 0, NUM_SECTIONS, dtype=jnp.int32)
    mix2 = jax.random.uniform(k8, (N2,), dtype=jnp.float32)
    loss2 = multi_section_prediction_loss(logits2, section2, mix2, other2,
                                          block_n=128)
    loss2 = jax.block_until_ready(loss2)
    ref2 = _reference_loss(logits2, section2, mix2, other2)
    assert loss2.shape == (N2,)
    assert jnp.all(jnp.isfinite(loss2))
    assert jnp.allclose(loss2, ref2, atol=2e-2, rtol=2e-2)  # bf16 inputs

    print("KERNEL_OK")
</pallas_src>

<mosaic_0001>
module attributes {stable_mosaic.version = 11 : i64} {
  func.func @_loss_kernel(%arg0: i32, %arg1: memref<6x128xf32, #tpu.memory_space<vmem>>, %arg2: memref<3x128xf32, #tpu.memory_space<vmem>>, %arg3: memref<1x128xf32, #tpu.memory_space<vmem>>) attributes {dimension_semantics = [#tpu.dimension_semantics<parallel>], iteration_bounds = array<i64: 1>, scalar_prefetch = 0 : i64, scratch_operands = 0 : i64, tpu.core_type = #tpu.core_type<tc>, window_params = [{transform_indices = @transform_0, window_bounds = array<i64: 6, 128>}, {transform_indices = @transform_1, window_bounds = array<i64: 3, 128>}, {transform_indices = @transform_2, window_bounds = array<i64: 1, 128>}]} {
    %c0 = arith.constant 0 : index
    %c0_0 = arith.constant 0 : index
    %0 = vector.load %arg1[%c0, %c0_0] : memref<6x128xf32, #tpu.memory_space<vmem>>, vector<6x128xf32>
    %c0_1 = arith.constant 0 : index
    %c0_2 = arith.constant 0 : index
    %1 = vector.load %arg2[%c0_1, %c0_2] : memref<3x128xf32, #tpu.memory_space<vmem>>, vector<1x128xf32>
    %c1 = arith.constant 1 : index
    %c0_3 = arith.constant 0 : index
    %2 = vector.load %arg2[%c1, %c0_3] : memref<3x128xf32, #tpu.memory_space<vmem>>, vector<1x128xf32>
    %c2 = arith.constant 2 : index
    %c0_4 = arith.constant 0 : index
    %3 = vector.load %arg2[%c2, %c0_4] : memref<3x128xf32, #tpu.memory_space<vmem>>, vector<1x128xf32>
    %cst = arith.constant dense<0xFF800000> : vector<128xf32>
    %4 = vector.multi_reduction <maximumf>, %0, %cst [0] : vector<6x128xf32> to vector<128xf32>
    %5 = vector.shape_cast %4 : vector<128xf32> to vector<1x128xf32>
    %6 = vector.broadcast %5 : vector<1x128xf32> to vector<6x128xf32>
    %7 = arith.subf %0, %6 : vector<6x128xf32>
    %8 = math.exp %7 : vector<6x128xf32>
    %cst_5 = arith.constant dense<0.000000e+00> : vector<128xf32>
    %9 = vector.multi_reduction <add>, %8, %cst_5 [0] : vector<6x128xf32> to vector<128xf32>
    %10 = vector.shape_cast %9 : vector<128xf32> to vector<1x128xf32>
    %11 = math.log %10 : vector<1x128xf32>
    %12 = tpu.iota {dimensions = array<i32: 0>} : vector<6x128xi32>
    %13 = arith.sitofp %12 : vector<6x128xi32> to vector<6x128xf32>
    %14 = vector.broadcast %1 : vector<1x128xf32> to vector<6x128xf32>
    %15 = arith.cmpf oeq, %13, %14 : vector<6x128xf32>
    %cst_6 = arith.constant 0.000000e+00 : f32
    %16 = vector.shape_cast %3 : vector<1x128xf32> to vector<1x128xf32>
    %17 = vector.broadcast %16 : vector<1x128xf32> to vector<6x128xf32>
    %18 = vector.broadcast %cst_6 : f32 to vector<6x128xf32>
    %19 = arith.select %15, %17, %18 : vector<6x128xi1>, vector<6x128xf32>
    %20 = vector.broadcast %2 : vector<1x128xf32> to vector<6x128xf32>
    %21 = arith.cmpf oeq, %13, %20 : vector<6x128xf32>
    %cst_7 = arith.constant 1.000000e+00 : f32
    %22 = vector.broadcast %cst_7 : f32 to vector<1x128xf32>
    %23 = arith.subf %22, %3 : vector<1x128xf32>
    %24 = vector.shape_cast %23 : vector<1x128xf32> to vector<1x128xf32>
    %25 = vector.broadcast %24 : vector<1x128xf32> to vector<6x128xf32>
    %26 = arith.select %21, %25, %19 : vector<6x128xi1>, vector<6x128xf32>
    %cst_8 = arith.constant dense<0.000000e+00> : vector<128xf32>
    %27 = vector.multi_reduction <add>, %26, %cst_8 [0] : vector<6x128xf32> to vector<128xf32>
    %28 = vector.shape_cast %27 : vector<128xf32> to vector<1x128xf32>
    %29 = arith.mulf %26, %7 : vector<6x128xf32>
    %cst_9 = arith.constant dense<0.000000e+00> : vector<128xf32>
    %30 = vector.multi_reduction <add>, %29, %cst_9 [0] : vector<6x128xf32> to vector<128xf32>
    %31 = vector.shape_cast %30 : vector<128xf32> to vector<1x128xf32>
    %32 = arith.mulf %28, %11 : vector<1x128xf32>
    %33 = arith.subf %32, %31 : vector<1x128xf32>
    %c0_10 = arith.constant 0 : index
    %c0_11 = arith.constant 0 : index
    %34 = vector.load %arg3[%c0_10, %c0_11] : memref<1x128xf32, #tpu.memory_space<vmem>>, vector<1x128xf32>
    tpu.vector_store %arg3[%c0_10, %c0_11], %33 {strides = array<i32>} : memref<1x128xf32, #tpu.memory_space<vmem>>, vector<1x128xf32>,
    return
  }
  func.func @transform_0(%arg0: i32) -> (i32, i32) {
    %c0_i32 = arith.constant 0 : i32
    %c0_i32_0 = arith.constant 0 : i32
    return %c0_i32, %arg0 : i32, i32
  }
  func.func @transform_1(%arg0: i32) -> (i32, i32) {
    %c0_i32 = arith.constant 0 : i32
    %c0_i32_0 = arith.constant 0 : i32
    return %c0_i32, %arg0 : i32, i32
  }
  func.func @transform_2(%arg0: i32) -> (i32, i32) {
    %c0_i32 = arith.constant 0 : i32
    %c0_i32_0 = arith.constant 0 : i32
    return %c0_i32, %arg0 : i32, i32
  }
}

</mosaic_0001>

<bundles_post_ra>
// kernel: tpu_custom_call.1
= control target key start
LH: loop header
LB: loop body
LE: loop exit
PB: predicated region body
PF: predicated region fallthrough
CT: control target
= control target key end

     0   :  { %7 = vsyncpa [#allocation3], 0  ;;  %s257_s0 = inlined_call_operand.hbm [shape: f32[6,128], index: 0, kind: input, shape index: {}]   ;;  %s258_s1 = inlined_call_operand.hbm [shape: f32[3,128], index: 1, kind: input, shape index: {}]   ;;  %s259_s2 = inlined_call_operand.hbm [shape: f32[1,128], index: 2, kind: output, shape index: {}]  }
   0x1   :  { %8 = vsyncpa [#allocation6], 0 }
   0x2   :  { %9 = vsyncpa [#allocation4], 0  ;;  %s199_s9 = smov [#allocation2]   ;;  %s200_s11 = smov [#allocation5]  }
   0x3   :  { %s16_s10 = sshll.u32 %s199_s9, 4  ;;  %s26_s12 = sshll.u32 %s200_s11, 4  ;;  %s17_s10 = int_to_ptr.vmem [resolvable:$true] %s16_s10  ;;  %s27_s12 = int_to_ptr.vmem [resolvable:$true] %s26_s12 }
   0x4   :  { %s127_s15 = scalar_lea.hbm %s257_s0, 128 }
   0x5   :  { %p128_p0 = scmp.ne.s32.totalorder %s257_s0, %s127_s15  ;;  %p131_p1 = scmp.lt.u32.totalorder %s127_s15, %s257_s0 }
   0x7   :  { %p133_p2 = pnand %p131_p1, %p128_p0 }
   0x9   :  { %136 = shalt.err (!%p133_p2)
}
   0xa   :  { %s137_s20 = scalar_lea.vmem %s17_s10, 128  ;;  %p142_p4 = scmp.lt.s32.totalorder %s17_s10, %s17_s10 }
   0xb   :  { %p138_p3 = scmp.ne.s32.totalorder %s17_s10, %s137_s20  ;;  %p143_p5 = scmp.lt.s32.totalorder %s137_s20, %s137_s20 }
   0xd   :  { %p144_p6 = por %p143_p5, %p142_p4 }
   0xf   :  { %p145_p7 = pnand %p144_p6, %p138_p3 }
  0x11   :  { %148 = shalt.err (!%p145_p7)
}
  0x12   :  { %19 = dma.hbm_to_vmem [thread:$0]  %s257_s0, 128, %s17_s10, [#allocation3]  }
  0x13   :  { %s149_s25 = scalar_lea.hbm %s258_s1, 64 }
  0x14   :  { %p150_p8 = scmp.ne.s32.totalorder %s258_s1, %s149_s25  ;;  %p153_p9 = scmp.lt.u32.totalorder %s149_s25, %s258_s1 }
  0x16   :  { %p155_p10 = pnand %p153_p9, %p150_p8 }
  0x18   :  { %158 = shalt.err (!%p155_p10)
}
  0x19   :  { %s159_s30 = scalar_lea.vmem %s27_s12, 64  ;;  %p164_p12 = scmp.lt.s32.totalorder %s27_s12, %s27_s12 }
  0x1a   :  { %p160_p11 = scmp.ne.s32.totalorder %s27_s12, %s159_s30  ;;  %p165_p13 = scmp.lt.s32.totalorder %s159_s30, %s159_s30 }
  0x1c   :  { %p166_p0 = por %p165_p13, %p164_p12 }
  0x1e   :  { %p167_p1 = pnand %p166_p0, %p160_p11 }
  0x20   :  { %170 = shalt.err (!%p167_p1)
}
  0x21   :  { %29 = dma.hbm_to_vmem [thread:$0]  %s258_s1, 64, %s27_s12, [#allocation6]  }
  0x22   :  { %193 = dma.done.wait [#allocation3], 128  }
  0x23   :  { %194 = vsyncadd [#allocation3], 4294967168 }
  0x24   :  { %195 = dma.done.wait [#allocation6], 64  }
  0x25   :  { %196 = vsyncadd [#allocation6], 4294967232  ;;  %vm40_vm0 = vcmask 1045504   ;;  %v36_v0 = vld [vmem:[#allocation2] sm:$0x3f]  ;;  %v60_v4 = vlaneseq  ;;  %s201_s1 = smov [#allocation7]  }
  0x26   :  { %v41_v1 = vsel %vm40_vm0, %v36_v0, -inf  ;;  %v39_v9 = vld [vmem:[#allocation5 + $0x2] sm:$0x1]  ;;  %v118_v13 = vld [vmem:[#allocation5] ss:$0 sm:$0xff]  ;;  %s108_s4 = sshll.u32 %s201_s1, 4  ;;  %s109_s4 = int_to_ptr.vmem [resolvable:$true] %s108_s4 }
  0x27   :  { %v42_v2 = vrot.slane %v41_v1, 4  ;;  %v61_v7 = vshrl.u32 %v60_v4, 7  ;;  %v78_v15 = vsub.f32 1.0, %v39_v9  ;;  %v119_v18 = vld [vmem:[#allocation5 + $0x1] ss:$0 sm:$0xff]  ;;  %s171_s5 = scalar_lea.vmem %s109_s4, 16  ;;  %p176_p3 = scmp.lt.s32.totalorder %s109_s4, %s109_s4 }
  0x28   :  { %p172_p2 = scmp.ne.s32.totalorder %s109_s4, %s171_s5  ;;  %s175_s6 = scalar_lea.vmem %s109_s4, 32 }
  0x29   :  { %v43_v3 = vmax.f32 %v41_v1, %v42_v2  ;;  %v70_v11 = vsub.s32 0, %v61_v7  ;;  %v62_v12 = vcvt.s32.f32 %v61_v7  ;;  %p177_p4 = scmp.lt.s32.totalorder %s175_s6, %s171_s5 }
  0x2b   :  { %v44_v5 = vrot.slane %v43_v3, 2  ;;  %v71_v17 = vrot.slane %v39_v9, %v70_v11  ;;  %vm67_vm1 = vcmp.eq.f32.partialorder %v62_v12, %v118_v13  ;;  %v82_v19 = vrot.slane %v78_v15, %v70_v11  ;;  %p178_p5 = por %p177_p4, %p176_p3 }
  0x2c   :  { %vm77_vm2 = vcmp.eq.f32.partialorder %v62_v12, %v119_v18 }
  0x2d   :  { %v45_v6 = vmax.f32 %v43_v3, %v44_v5  ;;  %v72_v20 = vsel %vm67_vm1, %v71_v17, 0.0  ;;  %p179_p6 = pnand %p178_p5, %p172_p2 }
  0x2e   :  { %v83_v21 = vsel %vm77_vm2, %v82_v19, %v72_v20 }
  0x2f   :  { %v46_v8 = vrot.slane %v45_v6, 1  ;;  %v84_v24 = vsel %vm40_vm0, %v83_v21, 0.0 }
  0x30   :  { %v85_v28 = vrot.slane %v84_v24, 4 }
  0x31   :  { %v47_v10 = vmax.f32 %v45_v6, %v46_v8 }
  0x32   :  { %v86_v32 = vadd.f32 %v85_v28, %v84_v24 }
  0x33   :  { %v48_v14 = vsub.f32 %v36_v0, %v47_v10 }
  0x34   :  { %v87_v36 = vrot.slane %v86_v32, 2 }
  0x35   :  { %v49_v16 = vmul.f32 1.442695, %v48_v14  ;;  %v91_v22 = vmul.f32 %v83_v21, %v48_v14 }
  0x36   :  { %v88_v39 = vadd.f32 %v87_v36, %v86_v32 }
  0x37   :  { %123 = vpow2.f32 %v49_v16  ;;  %v92_v27 = vsel %vm40_vm0, %v91_v22, 0.0 }
  0x38   :  { %v93_v30 = vrot.slane %v92_v27, 4  ;;  %v89_v41 = vrot.slane %v88_v39, 1 }
  0x3a   :  { %v94_v34 = vadd.f32 %v93_v30, %v92_v27  ;;  %v90_v43 = vadd.f32 %v89_v41, %v88_v39 }
  0x3c   :  { %v95_v38 = vrot.slane %v94_v34, 2 }
  0x3e   :  { %v96_v40 = vadd.f32 %v95_v38, %v94_v34 }
  0x40   :  { %v97_v42 = vrot.slane %v96_v40, 1 }
  0x41   :  { %v124_v23 = vpop.eup %123 }
  0x42   :  { %v51_v25 = vsel %vm40_vm0, %v124_v23, 0.0  ;;  %v98_v46 = vadd.f32 %v97_v42, %v96_v40 }
  0x43   :  { %v52_v26 = vrot.slane %v51_v25, 4 }
  0x45   :  { %v53_v29 = vadd.f32 %v52_v26, %v51_v25 }
  0x47   :  { %v54_v31 = vrot.slane %v53_v29, 2 }
  0x49   :  { %v55_v33 = vadd.f32 %v54_v31, %v53_v29 }
  0x4b   :  { %v56_v35 = vrot.slane %v55_v33, 1 }
  0x4d   :  { %v57_v37 = vadd.f32 %v56_v35, %v55_v33 }
  0x4f   :  { %125 = vlog2.f32 %v57_v37 }
  0x59   :  { %v126_v44 = vpop.eup %125 }
  0x5a   :  { %v59_v45 = vmul.f32 0.6931472, %v126_v44 }
  0x5c   :  { %v99_v47 = vmul.f32 %v90_v43, %v59_v45 }
  0x5e   :  { %v100_v48 = vsub.f32 %v99_v47, %v98_v46 }
  0x60   :  { %101 = vst [vmem:[#allocation7] sm:$0x1] %v100_v48 }
  0x61   :  { %182 = shalt.err (!%p179_p6)
}
  0x62   :  { %s183_s9 = scalar_lea.hbm %s259_s2, 16 }
  0x63   :  { %p184_p7 = scmp.ne.s32.totalorder %s259_s2, %s183_s9  ;;  %p187_p8 = scmp.lt.u32.totalorder %s183_s9, %s259_s2 }
  0x65   :  { %p189_p9 = pnand %p187_p8, %p184_p7 }
  0x67   :  { %192 = shalt.err (!%p189_p9)
}
  0x68   :  { %111 = dma.vmem_to_hbm [thread:$0]  %s109_s4, 16, %s259_s2, [#allocation4]  }
  0x69   :  { %197 = dma.done.wait [#allocation4], 16  }
  0x6a   :  { %198 = vsyncadd [#allocation4], 4294967280 }
  0x6b   :  { %115 = vsyncpa [#allocation3], 1 }
  0x6c   :  { %116 = vsyncpa [#allocation6], 1 }
  0x6d   :  { %117 = vsyncpa [#allocation4], 1 }

</bundles_post_ra>
